<compile_context>
chip_gen: v7x
topology: tpu7x:2x2x1
jax: 0.10.0
libtpu: 0.0.40
codegen_flags: <defaults>
</compile_context>

<pallas_src>
import math
import functools

import jax
import jax.numpy as jnp
from jax import lax
from jax.experimental import pallas as pl
from jax.experimental.pallas import tpu as pltpu

NEG_INF = -1e30  # large finite negative; see correctness note on fully-masked rows above


def _mhca_kernel(q_ref, mem_ref, bias_ref,
                 wq_ref, bq_ref, wvk_ref, bvk_ref, wo_ref, bo_ref,
                 *out_and_scratch,
                 n_heads, d_model, d_k, scale, with_weights, approx_recip):
    if with_weights:
        ctx_ref, attn_ref, kv_ref, ctx_acc_ref = out_and_scratch
    else:
        ctx_ref, kv_ref, ctx_acc_ref = out_and_scratch
        attn_ref = None

    t1 = q_ref.shape[1]
    t2 = mem_ref.shape[1]

    # --- K/V projection hoisted out of the T1-tile loop: compute once per batch
    #     (first T1 tile); kv_ref is persistent VMEM scratch across grid steps. ---
    @pl.when(pl.program_id(1) == 0)
    def _():
        mem = mem_ref[0]                                              # (T2, memory_dim)
        kv = (jnp.dot(mem, wvk_ref[...], preferred_element_type=jnp.float32)
              + bvk_ref[...])                                         # f32 (T2, 2*d_model)
        kv_ref[...] = kv.astype(kv_ref.dtype)                         # store bf16

    # --- scaled query projection (scale folded in), bf16 operand for the MXU ---
    q = q_ref[0]                                                      # (t1, d_model)
    qp = (jnp.dot(q, wq_ref[...], preferred_element_type=jnp.float32)
          + bq_ref[...]) * scale
    qp = qp.astype(q_ref.dtype)

    # hoist the mask-bias broadcast out of the head loop (no CSE of broadcast_in_dim)
    bias_full = jnp.broadcast_to(bias_ref[0], (t1, t2))               # f32 (t1, T2)

    for h in range(n_heads):                          # static unroll over heads
        lo, hi = h * d_k, (h + 1) * d_k
        qh = qp[:, lo:hi]                             # (t1, d_k)   bf16
        kh = kv_ref[:, lo:hi]                         # (T2, d_k)   bf16
        vh = kv_ref[:, d_model + lo:d_model + hi]     # (T2, d_k)   bf16

        # q @ k^T without materializing a transpose ("NT" contraction on last dims)
        s = lax.dot_general(qh, kh,
                            dimension_numbers=(((1,), (1,)), ((), ())),
                            preferred_element_type=jnp.float32)       # (t1, T2) f32
        s = s + bias_full

        # numerically-stable softmax over T2
        m = jnp.max(s, axis=-1, keepdims=True)
        e = jnp.exp(s - m)
        denom = jnp.sum(e, axis=-1, keepdims=True)
        w = e * pl.reciprocal(denom, approx=approx_recip)             # (t1, T2) f32

        if with_weights:
            attn_ref[0, h] = w.astype(attn_ref.dtype)

        # assemble heads directly into VMEM scratch (no jnp.concatenate);
        # PV matmul runs with bf16 operands, f32 accumulation.
        ctx_acc_ref[:, lo:hi] = jnp.dot(w.astype(kv_ref.dtype), vh,
                                        preferred_element_type=jnp.float32)

    # output projection: single full-contraction (d_model) matmul
    out = (jnp.dot(ctx_acc_ref[...].astype(wo_ref.dtype), wo_ref[...],
                   preferred_element_type=jnp.float32) + bo_ref[...])
    ctx_ref[0] = out.astype(ctx_ref.dtype)


def _vmem_estimate_bytes(*, t1, t2, d_model, memory_dim, n_heads, mask_rows,
                         in_bytes, attn_bytes, ctx_bytes, with_weights):
    """Rough per-grid-step VMEM footprint, incl. default double-buffering."""
    est = 0
    est += 2 * t1 * d_model * in_bytes                                   # query block
    est += 2 * t2 * memory_dim * in_bytes                                # memory block
    est += 2 * mask_rows * t2 * 4                                        # mask bias block
    est += 2 * (2 * d_model * d_model + memory_dim * 2 * d_model) * in_bytes  # Wq, Wo, Wvk
    est += 2 * 4 * d_model * 4                                           # f32 biases
    est += 2 * t1 * d_model * ctx_bytes                                  # context output
    if with_weights:
        est += 2 * n_heads * t1 * t2 * attn_bytes                        # attn output
    est += t2 * 2 * d_model * in_bytes                                   # kv scratch
    est += t1 * d_model * 4                                              # ctx accumulator
    est += 4 * t1 * t2 * 4                                               # per-head f32 temps
    return est


def multi_headed_cross_attention(query, memory, memory_mask, params, *,
                                 n_heads,
                                 attn_dtype=jnp.bfloat16,
                                 compute_dtype=jnp.bfloat16,
                                 return_weights=True):
    B, T1, d_model = query.shape
    _, T2, memory_dim = memory.shape
    d_k = d_model // n_heads
    assert n_heads * d_k == d_model

    wq, bq, wvk, bvk, wo, bo = params

    # Normalize mask to (B, Tm, T2), Tm in {1, T1}; convert ONCE to an additive f32 bias.
    if memory_mask.ndim == 2:
        memory_mask = memory_mask[:, None, :]
    assert memory_mask.ndim == 3 and memory_mask.shape[0] == B
    Tm = memory_mask.shape[1]
    assert Tm in (1, T1), "mask must be (B, 1, T2) or (B, T1, T2)"
    bias = jnp.where(memory_mask, 0.0, NEG_INF).astype(jnp.float32)

    # bf16 MXU operands with f32 accumulation; biases stay f32.
    query_c = query.astype(compute_dtype)
    memory_c = memory.astype(compute_dtype)
    wq_c, wvk_c, wo_c = (w.astype(compute_dtype) for w in (wq, wvk, wo))
    bq_c, bvk_c, bo_c = (b.astype(jnp.float32) for b in (bq, bvk, bo))

    in_bytes = jnp.dtype(compute_dtype).itemsize
    attn_bytes = jnp.dtype(attn_dtype).itemsize
    ctx_bytes = jnp.dtype(query.dtype).itemsize

    # VMEM-aware T1-tile selection + explicit scoped-VMEM limit.
    try:
        vmem_cap = int(pltpu.get_tpu_info().vmem_capacity_bytes)
    except Exception:
        vmem_cap = 64 * 1024 * 1024  # conservative (v7x per-TensorCore physical VMEM)
    budget = int(0.75 * vmem_cap)

    def est(t1_tile):
        return _vmem_estimate_bytes(
            t1=t1_tile, t2=T2, d_model=d_model, memory_dim=memory_dim,
            n_heads=n_heads, mask_rows=(t1_tile if Tm == T1 else 1),
            in_bytes=in_bytes, attn_bytes=attn_bytes, ctx_bytes=ctx_bytes,
            with_weights=return_weights)

    candidates = [c for c in (512, 256, 128, 64) if c <= T1 and T1 % c == 0]
    if not candidates:
        t1_tile = T1
    else:
        t1_tile = candidates[-1]
        for c in candidates:                    # largest first, budget-aware
            if est(c) <= budget:
                t1_tile = c
                break
    n_t1 = T1 // t1_tile

    vmem_limit = int(min(vmem_cap, max(int(1.3 * est(t1_tile)), 32 * 1024 * 1024)))

    if Tm == T1:
        mask_blk = t1_tile
        bias_map = lambda b, i: (b, i, 0)
    else:
        mask_blk = 1
        bias_map = lambda b, i: (b, 0, 0)

    kernel = functools.partial(
        _mhca_kernel, n_heads=n_heads, d_model=d_model, d_k=d_k,
        scale=1.0 / math.sqrt(d_k), with_weights=return_weights,
        approx_recip=(jnp.dtype(attn_dtype) != jnp.dtype(jnp.float32)))

    in_specs = [
        pl.BlockSpec((1, t1_tile, d_model), lambda b, i: (b, i, 0)),   # query tile
        pl.BlockSpec((1, T2, memory_dim), lambda b, i: (b, 0, 0)),     # memory (per batch)
        pl.BlockSpec((1, mask_blk, T2), bias_map),                     # additive mask bias
        pl.BlockSpec((d_model, d_model), lambda b, i: (0, 0)),         # Wq
        pl.BlockSpec((1, d_model), lambda b, i: (0, 0)),               # bq (f32)
        pl.BlockSpec((memory_dim, 2 * d_model), lambda b, i: (0, 0)),  # Wvk
        pl.BlockSpec((1, 2 * d_model), lambda b, i: (0, 0)),           # bvk (f32)
        pl.BlockSpec((d_model, d_model), lambda b, i: (0, 0)),         # Wo
        pl.BlockSpec((1, d_model), lambda b, i: (0, 0)),               # bo (f32)
    ]

    ctx_spec = pl.BlockSpec((1, t1_tile, d_model), lambda b, i: (b, i, 0))
    ctx_shape = jax.ShapeDtypeStruct((B, T1, d_model), query.dtype)
    if return_weights:
        out_specs = [ctx_spec,
                     pl.BlockSpec((1, n_heads, t1_tile, T2), lambda b, i: (b, 0, i, 0))]
        out_shape = (ctx_shape,
                     jax.ShapeDtypeStruct((B, n_heads, T1, T2), attn_dtype))
    else:
        out_specs = [ctx_spec]
        out_shape = (ctx_shape,)

    grid_spec = pltpu.PrefetchScalarGridSpec(
        num_scalar_prefetch=0,
        grid=(B, n_t1),
        in_specs=in_specs,
        out_specs=out_specs,
        scratch_shapes=[
            pltpu.VMEM((T2, 2 * d_model), compute_dtype),   # persistent K/V projection
            pltpu.VMEM((t1_tile, d_model), jnp.float32),    # per-tile context accumulator
        ],
    )

    # Advisory cost estimate: 4 matmul stages, exp count, HBM bytes (attn writeback dominates).
    flops = 2 * B * (T1 * d_model * d_model                 # q projection
                     + T2 * memory_dim * 2 * d_model        # kv projection (once per batch)
                     + n_heads * T1 * T2 * d_k * 2          # QK^T + PV
                     + T1 * d_model * d_model)              # output projection
    bytes_accessed = (query_c.size * in_bytes + memory_c.size * in_bytes
                      + bias.size * 4
                      + (wq_c.size + wvk_c.size + wo_c.size) * in_bytes
                      + (bq.size + bvk.size + bo.size) * 4
                      + B * T1 * d_model * ctx_bytes
                      + (B * n_heads * T1 * T2 * attn_bytes if return_weights else 0))
    cost = pl.CostEstimate(flops=int(flops),
                           transcendentals=int(B * n_heads * T1 * T2),
                           bytes_accessed=int(bytes_accessed))

    # kv scratch carries state across T1 tiles -> T1 axis must be sequential when tiled.
    t1_sem = "arbitrary" if n_t1 > 1 else "parallel"

    outs = pl.pallas_call(
        kernel,
        out_shape=out_shape,
        grid_spec=grid_spec,
        compiler_params=pltpu.CompilerParams(
            dimension_semantics=("parallel", t1_sem),
            vmem_limit_bytes=vmem_limit),
        cost_estimate=cost,
    )(query_c, memory_c, bias, wq_c, bq_c, wvk_c, bvk_c, wo_c, bo_c)

    if return_weights:
        context, weights = outs
        return context, weights
    return outs[0], None


def _reference(query, memory, memory_mask, params, *, n_heads):
    # pure-JAX (f32) replica of the PyTorch forward, for verification
    B, T1, d_model = query.shape
    d_k = d_model // n_heads
    wq, bq, wvk, bvk, wo, bo = params

    q = query @ wq + bq
    kv = memory @ wvk + bvk
    k, v = kv[..., :d_model], kv[..., d_model:]

    def split_heads(x):
        return x.reshape(B, -1, n_heads, d_k).transpose(0, 2, 1, 3)

    qh, kh, vh = split_heads(q), split_heads(k), split_heads(v)
    scores = jnp.einsum('bhqd,bhkd->bhqk', qh, kh) / math.sqrt(d_k)
    scores = jnp.where(memory_mask[:, None, :, :], scores, -jnp.inf)
    w = jax.nn.softmax(scores, axis=-1)
    ctx = jnp.einsum('bhqk,bhkd->bhqd', w, vh)
    ctx = ctx.transpose(0, 2, 1, 3).reshape(B, T1, d_model)
    out = ctx @ wo + bo
    return out, w


if __name__ == "__main__":
    B, T1, T2 = 2, 8, 16
    d_model, memory_dim, n_heads = 32, 48, 4

    key = jax.random.PRNGKey(0)
    (k_q, k_m, k_mask, k_mask2, k_wq, k_bq, k_wvk, k_bvk, k_wo, k_bo) = jax.random.split(key, 10)

    query = jax.random.normal(k_q, (B, T1, d_model), dtype=jnp.float32)
    memory = jax.random.normal(k_m, (B, T2, memory_dim), dtype=jnp.float32)

    memory_mask = jax.random.bernoulli(k_mask, 0.8, (B, T1, T2))
    # guarantee at least one valid key per query row (reference uses -inf -> NaN otherwise)
    memory_mask = memory_mask.at[..., 0].set(True)

    # deterministic parameter init, stored as (in_features, out_features)
    wq = 0.02 * jax.random.normal(k_wq, (d_model, d_model), dtype=jnp.float32)
    bq = 0.01 * jax.random.normal(k_bq, (1, d_model), dtype=jnp.float32)
    wvk = 0.02 * jax.random.normal(k_wvk, (memory_dim, 2 * d_model), dtype=jnp.float32)
    bvk = 0.01 * jax.random.normal(k_bvk, (1, 2 * d_model), dtype=jnp.float32)
    wo = 0.02 * jax.random.normal(k_wo, (d_model, d_model), dtype=jnp.float32)
    bo = 0.01 * jax.random.normal(k_bo, (1, d_model), dtype=jnp.float32)
    params = (wq, bq, wvk, bvk, wo, bo)

    # 1) full (B, T1, T2) mask, weights returned (bf16 weights, bf16 MXU operands)
    ctx, attn = multi_headed_cross_attention(query, memory, memory_mask, params,
                                             n_heads=n_heads)
    jax.block_until_ready((ctx, attn))
    ctx_ref, attn_ref_w = _reference(query, memory, memory_mask, params, n_heads=n_heads)
    assert jnp.allclose(ctx, ctx_ref, atol=2e-2, rtol=2e-2), "context mismatch (full mask)"
    assert jnp.allclose(attn.astype(jnp.float32), attn_ref_w, atol=2e-2), "attn mismatch (full mask)"

    # 2) broadcast (B, 1, T2) mask path
    mask_b1 = jax.random.bernoulli(k_mask2, 0.8, (B, 1, T2)).at[..., 0].set(True)
    ctx2, attn2 = multi_headed_cross_attention(query, memory, mask_b1, params,
                                               n_heads=n_heads)
    jax.block_until_ready((ctx2, attn2))
    ctx2_ref, attn2_ref = _reference(query, memory, jnp.broadcast_to(mask_b1, (B, T1, T2)),
                                     params, n_heads=n_heads)
    assert jnp.allclose(ctx2, ctx2_ref, atol=2e-2, rtol=2e-2), "context mismatch (bcast mask)"
    assert jnp.allclose(attn2.astype(jnp.float32), attn2_ref, atol=2e-2), "attn mismatch (bcast mask)"

    # 3) no-weights path (skips the dominant HBM writeback entirely)
    ctx3, none_w = multi_headed_cross_attention(query, memory, memory_mask, params,
                                                n_heads=n_heads, return_weights=False)
    jax.block_until_ready(ctx3)
    assert none_w is None
    assert jnp.allclose(ctx3, ctx_ref, atol=2e-2, rtol=2e-2), "context mismatch (no weights)"

    print("KERNEL_OK")
</pallas_src>

<mosaic_0001>
module attributes {stable_mosaic.version = 11 : i64} {
  func.func @_mhca_kernel(%arg0: i32, %arg1: i32, %arg2: memref<1x8x32xbf16, #tpu.memory_space<vmem>>, %arg3: memref<1x16x48xbf16, #tpu.memory_space<vmem>>, %arg4: memref<1x8x16xf32, #tpu.memory_space<vmem>>, %arg5: memref<32x32xbf16, #tpu.memory_space<vmem>>, %arg6: memref<1x32xf32, #tpu.memory_space<vmem>>, %arg7: memref<48x64xbf16, #tpu.memory_space<vmem>>, %arg8: memref<1x64xf32, #tpu.memory_space<vmem>>, %arg9: memref<32x32xbf16, #tpu.memory_space<vmem>>, %arg10: memref<1x32xf32, #tpu.memory_space<vmem>>, %arg11: memref<1x8x32xf32, #tpu.memory_space<vmem>>, %arg12: memref<1x4x8x16xbf16, #tpu.memory_space<vmem>>, %arg13: memref<16x64xbf16, #tpu.memory_space<vmem>>, %arg14: memref<8x32xf32, #tpu.memory_space<vmem>>) attributes {dimension_semantics = [#tpu.dimension_semantics<parallel>, #tpu.dimension_semantics<parallel>], iteration_bounds = array<i64: 2, 1>, scalar_prefetch = 0 : i64, scratch_operands = 2 : i64, tpu.core_type = #tpu.core_type<tc>, window_params = [{transform_indices = @transform_0, window_bounds = array<i64: 1, 8, 32>}, {transform_indices = @transform_1, window_bounds = array<i64: 1, 16, 48>}, {transform_indices = @transform_2, window_bounds = array<i64: 1, 8, 16>}, {pipeline_mode = #tpu.pipeline_mode<synchronous>, transform_indices = @transform_3, window_bounds = array<i64: 32, 32>}, {pipeline_mode = #tpu.pipeline_mode<synchronous>, transform_indices = @transform_4, window_bounds = array<i64: 1, 32>}, {pipeline_mode = #tpu.pipeline_mode<synchronous>, transform_indices = @transform_5, window_bounds = array<i64: 48, 64>}, {pipeline_mode = #tpu.pipeline_mode<synchronous>, transform_indices = @transform_6, window_bounds = array<i64: 1, 64>}, {pipeline_mode = #tpu.pipeline_mode<synchronous>, transform_indices = @transform_7, window_bounds = array<i64: 32, 32>}, {pipeline_mode = #tpu.pipeline_mode<synchronous>, transform_indices = @transform_8, window_bounds = array<i64: 1, 32>}, {transform_indices = @transform_9, window_bounds = array<i64: 1, 8, 32>}, {transform_indices = @transform_10, window_bounds = array<i64: 1, 4, 8, 16>}]} {
    %c0_i32 = arith.constant 0 : i32
    %0 = arith.cmpi eq, %arg1, %c0_i32 : i32
    %1 = arith.extui %0 : i1 to i32
    %c0_i32_0 = arith.constant 0 : i32
    %2 = arith.cmpi ne, %1, %c0_i32_0 : i32
    scf.if %2 {
      %c0_67 = arith.constant 0 : index
      %c0_68 = arith.constant 0 : index
      %c0_69 = arith.constant 0 : index
      %113 = vector.load %arg3[%c0_67, %c0_68, %c0_69] : memref<1x16x48xbf16, #tpu.memory_space<vmem>>, vector<1x16x48xbf16>
      %114 = vector.shape_cast %113 : vector<1x16x48xbf16> to vector<16x48xbf16>
      %c0_70 = arith.constant 0 : index
      %c0_71 = arith.constant 0 : index
      %115 = vector.load %arg7[%c0_70, %c0_71] : memref<48x64xbf16, #tpu.memory_space<vmem>>, vector<48x64xbf16>
      %cst_72 = arith.constant dense<0.000000e+00> : vector<16x64xf32>
      %116 = tpu.matmul %114, %115, %cst_72 {dimension_numbers = #tpu.dot_dimension_numbers<[1], [0], [0], [1], [0, 0, 1, 1], [], []>} : vector<16x48xbf16>, vector<48x64xbf16>, vector<16x64xf32> -> vector<16x64xf32>
      %c0_73 = arith.constant 0 : index
      %c0_74 = arith.constant 0 : index
      %117 = vector.load %arg8[%c0_73, %c0_74] : memref<1x64xf32, #tpu.memory_space<vmem>>, vector<1x64xf32>
      %118 = vector.broadcast %117 : vector<1x64xf32> to vector<16x64xf32>
      %119 = arith.addf %116, %118 : vector<16x64xf32>
      %120 = arith.truncf %119 : vector<16x64xf32> to vector<16x64xbf16>
      %c0_75 = arith.constant 0 : index
      %c0_76 = arith.constant 0 : index
      %121 = vector.load %arg13[%c0_75, %c0_76] : memref<16x64xbf16, #tpu.memory_space<vmem>>, vector<16x64xbf16>
      tpu.vector_store %arg13[%c0_75, %c0_76], %120 {strides = array<i32>} : memref<16x64xbf16, #tpu.memory_space<vmem>>, vector<16x64xbf16>,
    } else {
    }
    %c0 = arith.constant 0 : index
    %c0_1 = arith.constant 0 : index
    %c0_2 = arith.constant 0 : index
    %3 = vector.load %arg2[%c0, %c0_1, %c0_2] : memref<1x8x32xbf16, #tpu.memory_space<vmem>>, vector<1x8x32xbf16>
    %4 = vector.shape_cast %3 : vector<1x8x32xbf16> to vector<8x32xbf16>
    %c0_3 = arith.constant 0 : index
    %c0_4 = arith.constant 0 : index
    %5 = vector.load %arg5[%c0_3, %c0_4] : memref<32x32xbf16, #tpu.memory_space<vmem>>, vector<32x32xbf16>
    %cst = arith.constant dense<0.000000e+00> : vector<8x32xf32>
    %6 = tpu.matmul %4, %5, %cst {dimension_numbers = #tpu.dot_dimension_numbers<[1], [0], [0], [1], [0, 0, 1, 1], [], []>} : vector<8x32xbf16>, vector<32x32xbf16>, vector<8x32xf32> -> vector<8x32xf32>
    %c0_5 = arith.constant 0 : index
    %c0_6 = arith.constant 0 : index
    %7 = vector.load %arg6[%c0_5, %c0_6] : memref<1x32xf32, #tpu.memory_space<vmem>>, vector<1x32xf32>
    %8 = vector.broadcast %7 : vector<1x32xf32> to vector<8x32xf32>
    %9 = arith.addf %6, %8 : vector<8x32xf32>
    %cst_7 = arith.constant 0.353553385 : f32
    %10 = vector.broadcast %cst_7 : f32 to vector<8x32xf32>
    %11 = arith.mulf %9, %10 : vector<8x32xf32>
    %12 = arith.truncf %11 : vector<8x32xf32> to vector<8x32xbf16>
    %c0_8 = arith.constant 0 : index
    %c0_9 = arith.constant 0 : index
    %c0_10 = arith.constant 0 : index
    %13 = vector.load %arg4[%c0_8, %c0_9, %c0_10] : memref<1x8x16xf32, #tpu.memory_space<vmem>>, vector<1x8x16xf32>
    %14 = vector.shape_cast %13 : vector<1x8x16xf32> to vector<8x16xf32>
    %15 = vector.extract_strided_slice %12 {offsets = [0, 0], sizes = [8, 8], strides = [1, 1]} : vector<8x32xbf16> to vector<8x8xbf16>
    %c0_11 = arith.constant 0 : index
    %c0_12 = arith.constant 0 : index
    %16 = vector.load %arg13[%c0_11, %c0_12] : memref<16x64xbf16, #tpu.memory_space<vmem>>, vector<16x8xbf16>
    %c0_13 = arith.constant 0 : index
    %c32 = arith.constant 32 : index
    %17 = vector.load %arg13[%c0_13, %c32] : memref<16x64xbf16, #tpu.memory_space<vmem>>, vector<16x8xbf16>
    %cst_14 = arith.constant dense<0.000000e+00> : vector<8x16xf32>
    %18 = tpu.matmul %15, %16, %cst_14 {dimension_numbers = #tpu.dot_dimension_numbers<[1], [1], [0], [0], [0, 0, 1, 0], [], []>} : vector<8x8xbf16>, vector<16x8xbf16>, vector<8x16xf32> -> vector<8x16xf32>
    %19 = arith.addf %18, %14 : vector<8x16xf32>
    %cst_15 = arith.constant dense<0xFF800000> : vector<8xf32>
    %20 = vector.multi_reduction <maximumf>, %19, %cst_15 [1] : vector<8x16xf32> to vector<8xf32>
    %21 = vector.shape_cast %20 : vector<8xf32> to vector<8x1xf32>
    %22 = vector.broadcast %21 : vector<8x1xf32> to vector<8x16xf32>
    %23 = arith.subf %19, %22 : vector<8x16xf32>
    %24 = math.exp %23 : vector<8x16xf32>
    %cst_16 = arith.constant dense<0.000000e+00> : vector<8xf32>
    %25 = vector.multi_reduction <add>, %24, %cst_16 [1] : vector<8x16xf32> to vector<8xf32>
    %26 = vector.shape_cast %25 : vector<8xf32> to vector<8x1xf32>
    %27 = tpu.reciprocal %26 {approx = true} : vector<8x1xf32> -> vector<8x1xf32>
    %28 = vector.broadcast %27 : vector<8x1xf32> to vector<8x16xf32>
    %29 = arith.mulf %24, %28 : vector<8x16xf32>
    %30 = arith.truncf %29 : vector<8x16xf32> to vector<8x16xbf16>
    %c0_17 = arith.constant 0 : index
    %c0_18 = arith.constant 0 : index
    %c0_19 = arith.constant 0 : index
    %c0_20 = arith.constant 0 : index
    %31 = vector.load %arg12[%c0_17, %c0_18, %c0_19, %c0_20] : memref<1x4x8x16xbf16, #tpu.memory_space<vmem>>, vector<1x1x8x16xbf16>
    %32 = vector.shape_cast %31 : vector<1x1x8x16xbf16> to vector<8x16xbf16>
    %33 = vector.shape_cast %30 : vector<8x16xbf16> to vector<1x1x8x16xbf16>
    tpu.vector_store %arg12[%c0_17, %c0_18, %c0_19, %c0_20], %33 {strides = array<i32>} : memref<1x4x8x16xbf16, #tpu.memory_space<vmem>>, vector<1x1x8x16xbf16>,
    %34 = arith.truncf %29 : vector<8x16xf32> to vector<8x16xbf16>
    %cst_21 = arith.constant dense<0.000000e+00> : vector<8x8xf32>
    %35 = tpu.matmul %34, %17, %cst_21 {dimension_numbers = #tpu.dot_dimension_numbers<[1], [0], [0], [1], [0, 0, 1, 1], [], []>} : vector<8x16xbf16>, vector<16x8xbf16>, vector<8x8xf32> -> vector<8x8xf32>
    %c0_22 = arith.constant 0 : index
    %c0_23 = arith.constant 0 : index
    %36 = vector.load %arg14[%c0_22, %c0_23] : memref<8x32xf32, #tpu.memory_space<vmem>>, vector<8x8xf32>
    tpu.vector_store %arg14[%c0_22, %c0_23], %35 {strides = array<i32>} : memref<8x32xf32, #tpu.memory_space<vmem>>, vector<8x8xf32>,
    %37 = vector.extract_strided_slice %12 {offsets = [0, 8], sizes = [8, 8], strides = [1, 1]} : vector<8x32xbf16> to vector<8x8xbf16>
    %c0_24 = arith.constant 0 : index
    %c8 = arith.constant 8 : index
    %38 = vector.load %arg13[%c0_24, %c8] : memref<16x64xbf16, #tpu.memory_space<vmem>>, vector<16x8xbf16>
    %c0_25 = arith.constant 0 : index
    %c40 = arith.constant 40 : index
    %39 = vector.load %arg13[%c0_25, %c40] : memref<16x64xbf16, #tpu.memory_space<vmem>>, vector<16x8xbf16>
    %cst_26 = arith.constant dense<0.000000e+00> : vector<8x16xf32>
    %40 = tpu.matmul %37, %38, %cst_26 {dimension_numbers = #tpu.dot_dimension_numbers<[1], [1], [0], [0], [0, 0, 1, 0], [], []>} : vector<8x8xbf16>, vector<16x8xbf16>, vector<8x16xf32> -> vector<8x16xf32>
    %41 = arith.addf %40, %14 : vector<8x16xf32>
    %cst_27 = arith.constant dense<0xFF800000> : vector<8xf32>
    %42 = vector.multi_reduction <maximumf>, %41, %cst_27 [1] : vector<8x16xf32> to vector<8xf32>
    %43 = vector.shape_cast %42 : vector<8xf32> to vector<8x1xf32>
    %44 = vector.broadcast %43 : vector<8x1xf32> to vector<8x16xf32>
    %45 = arith.subf %41, %44 : vector<8x16xf32>
    %46 = math.exp %45 : vector<8x16xf32>
    %cst_28 = arith.constant dense<0.000000e+00> : vector<8xf32>
    %47 = vector.multi_reduction <add>, %46, %cst_28 [1] : vector<8x16xf32> to vector<8xf32>
    %48 = vector.shape_cast %47 : vector<8xf32> to vector<8x1xf32>
    %49 = tpu.reciprocal %48 {approx = true} : vector<8x1xf32> -> vector<8x1xf32>
    %50 = vector.broadcast %49 : vector<8x1xf32> to vector<8x16xf32>
    %51 = arith.mulf %46, %50 : vector<8x16xf32>
    %52 = arith.truncf %51 : vector<8x16xf32> to vector<8x16xbf16>
    %c0_29 = arith.constant 0 : index
    %c1 = arith.constant 1 : index
    %c0_30 = arith.constant 0 : index
    %c0_31 = arith.constant 0 : index
    %53 = vector.load %arg12[%c0_29, %c1, %c0_30, %c0_31] : memref<1x4x8x16xbf16, #tpu.memory_space<vmem>>, vector<1x1x8x16xbf16>
    %54 = vector.shape_cast %53 : vector<1x1x8x16xbf16> to vector<8x16xbf16>
    %55 = vector.shape_cast %52 : vector<8x16xbf16> to vector<1x1x8x16xbf16>
    tpu.vector_store %arg12[%c0_29, %c1, %c0_30, %c0_31], %55 {strides = array<i32>} : memref<1x4x8x16xbf16, #tpu.memory_space<vmem>>, vector<1x1x8x16xbf16>,
    %56 = arith.truncf %51 : vector<8x16xf32> to vector<8x16xbf16>
    %cst_32 = arith.constant dense<0.000000e+00> : vector<8x8xf32>
    %57 = tpu.matmul %56, %39, %cst_32 {dimension_numbers = #tpu.dot_dimension_numbers<[1], [0], [0], [1], [0, 0, 1, 1], [], []>} : vector<8x16xbf16>, vector<16x8xbf16>, vector<8x8xf32> -> vector<8x8xf32>
    %c0_33 = arith.constant 0 : index
    %c8_34 = arith.constant 8 : index
    %58 = vector.load %arg14[%c0_33, %c8_34] : memref<8x32xf32, #tpu.memory_space<vmem>>, vector<8x8xf32>
    tpu.vector_store %arg14[%c0_33, %c8_34], %57 {strides = array<i32>} : memref<8x32xf32, #tpu.memory_space<vmem>>, vector<8x8xf32>,
    %59 = vector.extract_strided_slice %12 {offsets = [0, 16], sizes = [8, 8], strides = [1, 1]} : vector<8x32xbf16> to vector<8x8xbf16>
    %c0_35 = arith.constant 0 : index
    %c16 = arith.constant 16 : index
    %60 = vector.load %arg13[%c0_35, %c16] : memref<16x64xbf16, #tpu.memory_space<vmem>>, vector<16x8xbf16>
    %c0_36 = arith.constant 0 : index
    %c48 = arith.constant 48 : index
    %61 = vector.load %arg13[%c0_36, %c48] : memref<16x64xbf16, #tpu.memory_space<vmem>>, vector<16x8xbf16>
    %cst_37 = arith.constant dense<0.000000e+00> : vector<8x16xf32>
    %62 = tpu.matmul %59, %60, %cst_37 {dimension_numbers = #tpu.dot_dimension_numbers<[1], [1], [0], [0], [0, 0, 1, 0], [], []>} : vector<8x8xbf16>, vector<16x8xbf16>, vector<8x16xf32> -> vector<8x16xf32>
    %63 = arith.addf %62, %14 : vector<8x16xf32>
    %cst_38 = arith.constant dense<0xFF800000> : vector<8xf32>
    %64 = vector.multi_reduction <maximumf>, %63, %cst_38 [1] : vector<8x16xf32> to vector<8xf32>
    %65 = vector.shape_cast %64 : vector<8xf32> to vector<8x1xf32>
    %66 = vector.broadcast %65 : vector<8x1xf32> to vector<8x16xf32>
    %67 = arith.subf %63, %66 : vector<8x16xf32>
    %68 = math.exp %67 : vector<8x16xf32>
    %cst_39 = arith.constant dense<0.000000e+00> : vector<8xf32>
    %69 = vector.multi_reduction <add>, %68, %cst_39 [1] : vector<8x16xf32> to vector<8xf32>
    %70 = vector.shape_cast %69 : vector<8xf32> to vector<8x1xf32>
    %71 = tpu.reciprocal %70 {approx = true} : vector<8x1xf32> -> vector<8x1xf32>
    %72 = vector.broadcast %71 : vector<8x1xf32> to vector<8x16xf32>
    %73 = arith.mulf %68, %72 : vector<8x16xf32>
    %74 = arith.truncf %73 : vector<8x16xf32> to vector<8x16xbf16>
    %c0_40 = arith.constant 0 : index
    %c2 = arith.constant 2 : index
    %c0_41 = arith.constant 0 : index
    %c0_42 = arith.constant 0 : index
    %75 = vector.load %arg12[%c0_40, %c2, %c0_41, %c0_42] : memref<1x4x8x16xbf16, #tpu.memory_space<vmem>>, vector<1x1x8x16xbf16>
    %76 = vector.shape_cast %75 : vector<1x1x8x16xbf16> to vector<8x16xbf16>
    %77 = vector.shape_cast %74 : vector<8x16xbf16> to vector<1x1x8x16xbf16>
    tpu.vector_store %arg12[%c0_40, %c2, %c0_41, %c0_42], %77 {strides = array<i32>} : memref<1x4x8x16xbf16, #tpu.memory_space<vmem>>, vector<1x1x8x16xbf16>,
    %78 = arith.truncf %73 : vector<8x16xf32> to vector<8x16xbf16>
    %cst_43 = arith.constant dense<0.000000e+00> : vector<8x8xf32>
    %79 = tpu.matmul %78, %61, %cst_43 {dimension_numbers = #tpu.dot_dimension_numbers<[1], [0], [0], [1], [0, 0, 1, 1], [], []>} : vector<8x16xbf16>, vector<16x8xbf16>, vector<8x8xf32> -> vector<8x8xf32>
    %c0_44 = arith.constant 0 : index
    %c16_45 = arith.constant 16 : index
    %80 = vector.load %arg14[%c0_44, %c16_45] : memref<8x32xf32, #tpu.memory_space<vmem>>, vector<8x8xf32>
    tpu.vector_store %arg14[%c0_44, %c16_45], %79 {strides = array<i32>} : memref<8x32xf32, #tpu.memory_space<vmem>>, vector<8x8xf32>,
    %81 = vector.extract_strided_slice %12 {offsets = [0, 24], sizes = [8, 8], strides = [1, 1]} : vector<8x32xbf16> to vector<8x8xbf16>
    %c0_46 = arith.constant 0 : index
    %c24 = arith.constant 24 : index
    %82 = vector.load %arg13[%c0_46, %c24] : memref<16x64xbf16, #tpu.memory_space<vmem>>, vector<16x8xbf16>
    %c0_47 = arith.constant 0 : index
    %c56 = arith.constant 56 : index
    %83 = vector.load %arg13[%c0_47, %c56] : memref<16x64xbf16, #tpu.memory_space<vmem>>, vector<16x8xbf16>
    %cst_48 = arith.constant dense<0.000000e+00> : vector<8x16xf32>
    %84 = tpu.matmul %81, %82, %cst_48 {dimension_numbers = #tpu.dot_dimension_numbers<[1], [1], [0], [0], [0, 0, 1, 0], [], []>} : vector<8x8xbf16>, vector<16x8xbf16>, vector<8x16xf32> -> vector<8x16xf32>
    %85 = arith.addf %84, %14 : vector<8x16xf32>
    %cst_49 = arith.constant dense<0xFF800000> : vector<8xf32>
    %86 = vector.multi_reduction <maximumf>, %85, %cst_49 [1] : vector<8x16xf32> to vector<8xf32>
    %87 = vector.shape_cast %86 : vector<8xf32> to vector<8x1xf32>
    %88 = vector.broadcast %87 : vector<8x1xf32> to vector<8x16xf32>
    %89 = arith.subf %85, %88 : vector<8x16xf32>
    %90 = math.exp %89 : vector<8x16xf32>
    %cst_50 = arith.constant dense<0.000000e+00> : vector<8xf32>
    %91 = vector.multi_reduction <add>, %90, %cst_50 [1] : vector<8x16xf32> to vector<8xf32>
    %92 = vector.shape_cast %91 : vector<8xf32> to vector<8x1xf32>
    %93 = tpu.reciprocal %92 {approx = true} : vector<8x1xf32> -> vector<8x1xf32>
    %94 = vector.broadcast %93 : vector<8x1xf32> to vector<8x16xf32>
    %95 = arith.mulf %90, %94 : vector<8x16xf32>
    %96 = arith.truncf %95 : vector<8x16xf32> to vector<8x16xbf16>
    %c0_51 = arith.constant 0 : index
    %c3 = arith.constant 3 : index
    %c0_52 = arith.constant 0 : index
    %c0_53 = arith.constant 0 : index
    %97 = vector.load %arg12[%c0_51, %c3, %c0_52, %c0_53] : memref<1x4x8x16xbf16, #tpu.memory_space<vmem>>, vector<1x1x8x16xbf16>
    %98 = vector.shape_cast %97 : vector<1x1x8x16xbf16> to vector<8x16xbf16>
    %99 = vector.shape_cast %96 : vector<8x16xbf16> to vector<1x1x8x16xbf16>
    tpu.vector_store %arg12[%c0_51, %c3, %c0_52, %c0_53], %99 {strides = array<i32>} : memref<1x4x8x16xbf16, #tpu.memory_space<vmem>>, vector<1x1x8x16xbf16>,
    %100 = arith.truncf %95 : vector<8x16xf32> to vector<8x16xbf16>
    %cst_54 = arith.constant dense<0.000000e+00> : vector<8x8xf32>
    %101 = tpu.matmul %100, %83, %cst_54 {dimension_numbers = #tpu.dot_dimension_numbers<[1], [0], [0], [1], [0, 0, 1, 1], [], []>} : vector<8x16xbf16>, vector<16x8xbf16>, vector<8x8xf32> -> vector<8x8xf32>
    %c0_55 = arith.constant 0 : index
    %c24_56 = arith.constant 24 : index
    %102 = vector.load %arg14[%c0_55, %c24_56] : memref<8x32xf32, #tpu.memory_space<vmem>>, vector<8x8xf32>
    tpu.vector_store %arg14[%c0_55, %c24_56], %101 {strides = array<i32>} : memref<8x32xf32, #tpu.memory_space<vmem>>, vector<8x8xf32>,
    %c0_57 = arith.constant 0 : index
    %c0_58 = arith.constant 0 : index
    %103 = vector.load %arg14[%c0_57, %c0_58] : memref<8x32xf32, #tpu.memory_space<vmem>>, vector<8x32xf32>
    %104 = arith.truncf %103 : vector<8x32xf32> to vector<8x32xbf16>
    %c0_59 = arith.constant 0 : index
    %c0_60 = arith.constant 0 : index
    %105 = vector.load %arg9[%c0_59, %c0_60] : memref<32x32xbf16, #tpu.memory_space<vmem>>, vector<32x32xbf16>
    %cst_61 = arith.constant dense<0.000000e+00> : vector<8x32xf32>
    %106 = tpu.matmul %104, %105, %cst_61 {dimension_numbers = #tpu.dot_dimension_numbers<[1], [0], [0], [1], [0, 0, 1, 1], [], []>} : vector<8x32xbf16>, vector<32x32xbf16>, vector<8x32xf32> -> vector<8x32xf32>
    %c0_62 = arith.constant 0 : index
    %c0_63 = arith.constant 0 : index
    %107 = vector.load %arg10[%c0_62, %c0_63] : memref<1x32xf32, #tpu.memory_space<vmem>>, vector<1x32xf32>
    %108 = vector.broadcast %107 : vector<1x32xf32> to vector<8x32xf32>
    %109 = arith.addf %106, %108 : vector<8x32xf32>
    %c0_64 = arith.constant 0 : index
    %c0_65 = arith.constant 0 : index
    %c0_66 = arith.constant 0 : index
    %110 = vector.load %arg11[%c0_64, %c0_65, %c0_66] : memref<1x8x32xf32, #tpu.memory_space<vmem>>, vector<1x8x32xf32>
    %111 = vector.shape_cast %110 : vector<1x8x32xf32> to vector<8x32xf32>
    %112 = vector.shape_cast %109 : vector<8x32xf32> to vector<1x8x32xf32>
    tpu.vector_store %arg11[%c0_64, %c0_65, %c0_66], %112 {strides = array<i32>} : memref<1x8x32xf32, #tpu.memory_space<vmem>>, vector<1x8x32xf32>,
    return
  }
  func.func @transform_0(%arg0: i32, %arg1: i32) -> (i32, i32, i32) {
    %c0_i32 = arith.constant 0 : i32
    %c0_i32_0 = arith.constant 0 : i32
    return %arg0, %arg1, %c0_i32 : i32, i32, i32
  }
  func.func @transform_1(%arg0: i32, %arg1: i32) -> (i32, i32, i32) {
    %c0_i32 = arith.constant 0 : i32
    %c0_i32_0 = arith.constant 0 : i32
    %c0_i32_1 = arith.constant 0 : i32
    return %arg0, %c0_i32, %c0_i32_0 : i32, i32, i32
  }
  func.func @transform_2(%arg0: i32, %arg1: i32) -> (i32, i32, i32) {
    %c0_i32 = arith.constant 0 : i32
    %c0_i32_0 = arith.constant 0 : i32
    return %arg0, %arg1, %c0_i32 : i32, i32, i32
  }
  func.func @transform_3(%arg0: i32, %arg1: i32) -> (i32, i32) {
    %c0_i32 = arith.constant 0 : i32
    %c0_i32_0 = arith.constant 0 : i32
    %c0_i32_1 = arith.constant 0 : i32
    return %c0_i32, %c0_i32_0 : i32, i32
  }
  func.func @transform_4(%arg0: i32, %arg1: i32) -> (i32, i32) {
    %c0_i32 = arith.constant 0 : i32
    %c0_i32_0 = arith.constant 0 : i32
    %c0_i32_1 = arith.constant 0 : i32
    return %c0_i32, %c0_i32_0 : i32, i32
  }
  func.func @transform_5(%arg0: i32, %arg1: i32) -> (i32, i32) {
    %c0_i32 = arith.constant 0 : i32
    %c0_i32_0 = arith.constant 0 : i32
    %c0_i32_1 = arith.constant 0 : i32
    return %c0_i32, %c0_i32_0 : i32, i32
  }
  func.func @transform_6(%arg0: i32, %arg1: i32) -> (i32, i32) {
    %c0_i32 = arith.constant 0 : i32
    %c0_i32_0 = arith.constant 0 : i32
    %c0_i32_1 = arith.constant 0 : i32
    return %c0_i32, %c0_i32_0 : i32, i32
  }
  func.func @transform_7(%arg0: i32, %arg1: i32) -> (i32, i32) {
    %c0_i32 = arith.constant 0 : i32
    %c0_i32_0 = arith.constant 0 : i32
    %c0_i32_1 = arith.constant 0 : i32
    return %c0_i32, %c0_i32_0 : i32, i32
  }
  func.func @transform_8(%arg0: i32, %arg1: i32) -> (i32, i32) {
    %c0_i32 = arith.constant 0 : i32
    %c0_i32_0 = arith.constant 0 : i32
    %c0_i32_1 = arith.constant 0 : i32
    return %c0_i32, %c0_i32_0 : i32, i32
  }
  func.func @transform_9(%arg0: i32, %arg1: i32) -> (i32, i32, i32) {
    %c0_i32 = arith.constant 0 : i32
    %c0_i32_0 = arith.constant 0 : i32
    return %arg0, %arg1, %c0_i32 : i32, i32, i32
  }
  func.func @transform_10(%arg0: i32, %arg1: i32) -> (i32, i32, i32, i32) {
    %c0_i32 = arith.constant 0 : i32
    %c0_i32_0 = arith.constant 0 : i32
    %c0_i32_1 = arith.constant 0 : i32
    return %arg0, %c0_i32, %arg1, %c0_i32_0 : i32, i32, i32, i32
  }
}

</mosaic_0001>

<bundles_post_ra>
// kernel: tpu_custom_call.1
= control target key start
LH: loop header
LB: loop body
LE: loop exit
PB: predicated region body
PF: predicated region fallthrough
CT: control target
= control target key end

     0   :  { %s2543_s0 = inlined_call_operand.hbm [shape: bf16[2,8,32], index: 0, kind: input, shape index: {}]   ;;  %s2544_s1 = inlined_call_operand.hbm [shape: bf16[2,16,48], index: 1, kind: input, shape index: {}]   ;;  %s2545_s2 = inlined_call_operand.hbm [shape: f32[2,8,16], index: 2, kind: input, shape index: {}]   ;;  %s2546_s3 = inlined_call_operand.hbm [shape: bf16[32,32], index: 3, kind: input, shape index: {}]   ;;  %s2547_s4 = inlined_call_operand.vmem [shape: f32[1,32], index: 4, kind: input, shape index: {}]   ;;  %s2548_s5 = inlined_call_operand.hbm [shape: bf16[48,64], index: 5, kind: input, shape index: {}]   ;;  %s2549_s6 = inlined_call_operand.vmem [shape: f32[1,64], index: 6, kind: input, shape index: {}]   ;;  %s2550_s7 = inlined_call_operand.vmem [shape: bf16[32,32], index: 7, kind: input, shape index: {}]   ;;  %s2551_s8 = inlined_call_operand.vmem [shape: f32[1,32], index: 8, kind: input, shape index: {}]   ;;  %s2552_s9 = inlined_call_operand.hbm [shape: f32[2,8,32], index: 9, kind: output, shape index: {0}]   ;;  %s2553_s10 = inlined_call_operand.hbm [shape: bf16[2,4,8,16], index: 10, kind: output, shape index: {1}]  }
   0x1   :  { %2579 = sst [smem:[#allocation25_spill]] %s2543_s0 }
   0x2   :  { %2580 = sst [smem:[#allocation26_spill]] %s2544_s1 }
   0x3   :  { %2581 = sst [smem:[#allocation27_spill]] %s2546_s3 }
   0x4   :  { %2582 = sst [smem:[#allocation28_spill]] %s2550_s7 }
   0x5   :  { %2583 = sst [smem:[#allocation29_spill]] %s2551_s8 }
   0x6   :  { %2584 = sst [smem:[#allocation30_spill]] %s2552_s9 }
   0x7   :  { %2585 = sst [smem:[#allocation31_spill]] %s2553_s10 }
   0x8   :  { %16 = vsyncpa [#allocation5], 0 }
   0x9   :  { %18 = vsyncpa [#allocation5 + $0x1], 0 }
   0xa   :  { %19 = vsyncpa [#allocation8], 0 }
   0xb   :  { %21 = vsyncpa [#allocation8 + $0x1], 0 }
   0xc   :  { %22 = vsyncpa [#allocation11], 0 }
   0xd   :  { %23 = vsyncpa [#allocation6], 0 }
   0xe   :  { %25 = vsyncpa [#allocation6 + $0x1], 0 }
   0xf   :  { %26 = vsyncpa [#allocation15], 0 }
  0x10   :  { %28 = vsyncpa [#allocation15 + $0x1], 0  ;;  %s2063_s13 = smov 0   ;;  %s2065_s14 = smov 0  }
  0x11   :  { %s2067_s15 = smov 0   ;;  %s2069_s16 = smov 0  }
  0x12   :  { %s2071_s17 = smov 0   ;;  %s2073_s18 = smov 0  }
  0x13 LB: > { %2586 = sst [smem:[#allocation21_spill]] %s1963_s13  ;;  %s2094_s19 = sadd.s32 4294967295, %s1983_s18   ;;  %s1983_s18 = sphi %s2073_s18, %s34_s18   ;;  %s1979_s17 = sphi %s2071_s17, %s2633_s17   ;;  %s1975_s16 = sphi %s2069_s16, %s2632_s16   ;;  %s1971_s15 = sphi %s2067_s15, %s2631_s15   ;;  %s1967_s14 = sphi %s2065_s14, %s2630_s14   ;;  %s1963_s13 = sphi %s2063_s13, %s2629_s13  }
  0x14   : > { %2587 = sst [smem:[#allocation22_spill]] %s1975_s16  ;;  %s1423_s20 = sadd.s32 4294967294, %s1983_s18  }
  0x15   : > { %p62_p0 = scmp.ne.s32.totalorder %s1971_s15, %s1967_s14  ;;  %p63_p1 = scmp.eq.s32.totalorder %s1983_s18, 0 }
  0x16   : > { %p68_p2 = scmp.ne.s32.totalorder %s1967_s14, %s1963_s13  ;;  %p2557_p3 = scmp.eq.s32.totalorder %s2094_s19, 0 }
  0x17   : > { %p274_p4 = scmp.eq.s32.totalorder %s2094_s19, 1  ;;  %p2105_p5 = por %p63_p1, %p62_p0 }
  0x18   : > { %p280_p6 = scmp.eq.s32.totalorder %s1423_s20, 1  ;;  %p2111_p7 = por %p2557_p3, %p68_p2 }
  0x19   : > { %p2115_p8 = por %p274_p4, %p62_p0  ;;  %p1424_p10 = scmp.ge.s32.totalorder %s1983_s18, 1 }
  0x1a   : > { %s2589_s23 = scalar_select %p2111_p7, 1, 0 }
  0x1b   : > { %s2590_s24 = scalar_select %p2115_p8, 1, 0 }
  0x1c   : > { %p2119_p9 = por %p280_p6, %p68_p2  ;;  %p315_p11 = scmp.lt.s32.totalorder %s1983_s18, 3 }
  0x1d   : > { %2591 = sst [smem:[#allocation23_spill]] %s2590_s24  ;;  %s1985_s27 = smov [#allocation10]  }
  0x1e   : > { %s2592_s25 = scalar_select %p2119_p9, 1, 0 }
  0x1f   : > { %p2125_p12 = pnand %p1424_p10, %p315_p11  ;;  %s327_s28 = sshll.u32 %s1985_s27, 4  ;;  %s2129_s28 = int_to_ptr.vmem [resolvable:$true] %s327_s28 }
  0x20   : > { %2593 = sst [smem:[#allocation24_spill]] %s2592_s25  ;;  %s46_s30 = sadd.s32 1, %s1979_s17 }
  0x21   : > { %s2594_s26 = scalar_select %p2125_p12, 1, 0 }
  0x22   : > { %p1595_p13 = pneg %p2125_p12  ;;  %s2143_s11 = sand.u32 1, %s1971_s15  }
  0x23   : > { %p2145_p4 = scmp.ge.s32.totalorder %s46_s30, 2  ;;  %s2597_s3 = sld [smem:[#allocation27_spill]] }
  0x24   : > { %p2137_p2 = pnand %p1595_p13, %p2557_p3 }
  0x26   : > { %s2595_s29 = scalar_select %p2137_p2, 1, 0 }
  0x27   : > { %p2572_p10 = pneg %p2137_p2 }
  0x29   : > { %s1715_s21 = scalar_lea.hbm %s2597_s3, 256 }
  0x2a   : > { %p1716_p6 = scmp.ne.s32.totalorder %s2597_s3, %s1715_s21  ;;  %p1722_p0 = scmp.lt.u32.totalorder %s1715_s21, %s2597_s3 }
  0x2c   : > { %p1718_p11 = pnand %p2572_p10, %p1716_p6 }
  0x2e   : > { %p1719_p13 = pneg %p1718_p11 }
  0x30   : > { %p1724_p3 = pnand %p1722_p0, %p1719_p13 }
  0x32   : > { %1727 = shalt.err (!%p1724_p3)
}
  0x33   : > { %s1728_s20 = scalar_lea.vmem %s2129_s28, 256  ;;  %p1736_p7 = scmp.lt.s32.totalorder %s2129_s28, %s2129_s28 }
  0x34   : > { %p1729_p1 = scmp.ne.s32.totalorder %s2129_s28, %s1728_s20  ;;  %p1737_p6 = scmp.lt.s32.totalorder %s1728_s20, %s1728_s20 }
  0x36   : > { %p1731_p9 = pnand %p1729_p1, %p2572_p10  ;;  %p1738_p11 = por %p1737_p6, %p1736_p7 }
  0x38   : > { %p1732_p8 = pneg %p1731_p9 }
  0x3a   : > { %p1739_p12 = pnand %p1738_p11, %p1732_p8 }
  0x3c   : > { %1742 = shalt.err (!%p1739_p12)
}
  0x3d   : > { %s2566_s8 = smov 64   ;;  %s2568_s9 = smov 4  }
  0x3e   : > { %1598 = dma.hbm_to_vmem [thread:$0]  (!%p2137_p2), %s2597_s3, 256, %s2129_s28, [#allocation11], %s2566_s8, %s2566_s8, %s2568_s9  }
  0x3f   : > { %s2635_s30 = smov (%p2145_p4, %s46_s30), 0  ;;  %p2598_p3 = scmp.lt.s32.totalorder %s1983_s18, 2 }
  0x40   : > { %s385_s27 = sand.u32 1, %s1983_s18   ;;  %s50_s20 = ssub.s32 %s1979_s17, %s2635_s30 }
  0x41   : > { %p2187_p7 = pnand %p2598_p3, %p2105_p5  ;;  %p53_p8 = scmp.eq.s32.totalorder %s50_s20, 0 }
  0x42   : > { %s2570_s10 = sshll.u32 %s2143_s11, 3  ;;  %s2571_s24 = sshll.u32 %s1979_s17, 7 }
  0x43   : > { %s2599_s25 = scalar_select %p2187_p7, 1, 0 }
  0x44   : > { %s2600_s16 = sadd.s32 1, %s1971_s15  ;;  %s2601_s1 = sld [smem:[#allocation26_spill]] }
  0x45   : > { %s2199_s7 = scalar_select %p53_p8, %s1971_s15, %s2600_s16  }
  0x46   : > { %s389_s13 = scalar_lea.vmem [#allocation7], %s2570_s10  ;;  %s1988_s20 = smov [#allocation12]  }
  0x47   : > { %s396_s21 = sshll.u32 %s389_s13, 4  ;;  %s2212_s8 = sshll.u32 %s1988_s20, 4  ;;  %s2210_s21 = int_to_ptr.vmem [resolvable:$true] %s396_s21  ;;  %s344_s8 = int_to_ptr.vmem [resolvable:$true] %s2212_s8 }
  0x48   : > { %s2214_s16 = scalar_lea.sflag [#allocation8], %s385_s27  ;;  %p2220_p9 = pneg %p2187_p7 }
  0x4a   : > { %s2206_s22 = scalar_lea.hbm %s2601_s1, %s2571_s24  ;;  %s1748_s10 = scalar_lea.hbm %s2601_s1, 256 }
  0x4b   : > { %s1743_s9 = scalar_lea.hbm %s2206_s22, 128  ;;  %p1749_p1 = scmp.lt.u32.totalorder %s2206_s22, %s2601_s1 }
  0x4c   : > { %p1744_p5 = scmp.ne.s32.totalorder %s2206_s22, %s1743_s9  ;;  %p1750_p4 = scmp.lt.u32.totalorder %s1748_s10, %s1743_s9 }
  0x4d   : > { %s2602_s28 = scalar_select %p2220_p9, 1, 0 }
  0x4e   : > { %p1746_p12 = pnand %p2220_p9, %p1744_p5  ;;  %p1751_p13 = por %p1750_p4, %p1749_p1 }
  0x4f   : > { %p1752_p6 = scmp.lt.u32.totalorder %s1743_s9, %s2206_s22 }
  0x50   : > { %p1747_p0 = pneg %p1746_p12 }
  0x51   : > { %p1753_p11 = por %p1752_p6, %p1751_p13 }
  0x53   : > { %p1754_p3 = pnand %p1753_p11, %p1747_p0 }
  0x55   : > { %1757 = shalt.err (!%p1754_p3)
}
  0x56   : > { %s1758_s27 = scalar_lea.vmem %s2210_s21, 128  ;;  %s1989_s12 = smov [#allocation7]  }
  0x57   : > { %p1759_p8 = scmp.ne.s32.totalorder %s2210_s21, %s1758_s27  ;;  %s1763_s13 = sshll.u32 %s1989_s12, 4  ;;  %s1764_s13 = int_to_ptr.vmem [resolvable:$false] %s1763_s13 }
  0x58   : > { %s1765_s24 = scalar_lea.vmem %s1764_s13, 256  ;;  %p1766_p10 = scmp.lt.s32.totalorder %s2210_s21, %s1764_s13 }
  0x59   : > { %p1761_p5 = pnand %p1759_p8, %p2220_p9  ;;  %p1767_p2 = scmp.lt.s32.totalorder %s1765_s24, %s1758_s27 }
  0x5b   : > { %p1762_p12 = pneg %p1761_p5  ;;  %p1768_p1 = por %p1767_p2, %p1766_p10 }
  0x5d   : > { %p1769_p4 = pnand %p1768_p1, %p1762_p12 }
  0x5f   : > { %1772 = shalt.err (!%p1769_p4)
}
  0x60   : > { %s2603_s10 = smov 4   ;;  %s2604_s9 = smov 64  }
  0x61   : > { %1608 = dma.hbm_to_vmem [thread:$0]  (!%p2187_p7), %s2206_s22, 128, %s2210_s21, %s2214_s16, %s2604_s9, %s2604_s9, %s2603_s10  }
  0x62   : > { %s1773_s13 = scalar_lea.hbm %s2548_s5, 384  ;;  %p2605_p10 = scmp.ne.s32.totalorder %s2595_s29, 0 }
  0x63   : > { %p1774_p2 = scmp.ne.s32.totalorder %s2548_s5, %s1773_s13  ;;  %p1780_p11 = scmp.lt.u32.totalorder %s1773_s13, %s2548_s5 }
  0x64   : > { %p2606_p0 = pneg %p2605_p10 }
  0x66   : > { %p1776_p13 = pnand %p1774_p2, %p2606_p0 }
  0x68   : > { %p1777_p6 = pneg %p1776_p13 }
  0x6a   : > { %p1782_p3 = pnand %p1780_p11, %p1777_p6 }
  0x6c   : > { %1785 = shalt.err (!%p1782_p3)
}
  0x6d   : > { %s1786_s22 = scalar_lea.vmem %s344_s8, 384  ;;  %p2607_p5 = pmov %p2606_p0 }
  0x6e   : > { %p1787_p8 = scmp.ne.s32.totalorder %s344_s8, %s1786_s22  ;;  %p1794_p4 = scmp.lt.s32.totalorder %s344_s8, %s344_s8 }
  0x6f   : > { %p1795_p7 = scmp.lt.s32.totalorder %s1786_s22, %s1786_s22 }
  0x70   : > { %p1789_p12 = pnand %p1787_p8, %p2607_p5 }
  0x71   : > { %p1796_p9 = por %p1795_p7, %p1794_p4 }
  0x72   : > { %p1790_p1 = pneg %p1789_p12 }
  0x74   : > { %p1797_p0 = pnand %p1796_p9, %p1790_p1 }
  0x76   : > { %1800 = shalt.err (!%p1797_p0)
}
  0x77   : > { %1601 = dma.hbm_to_vmem [thread:$0]  (!%p2605_p10), %s2548_s5, 384, %s344_s8, [#allocation11], %s2604_s9, %s2604_s9, %s2603_s10  }
  0x78   : > { %s1428_s21 = sshll.u32 %s2143_s11, 2  ;;  %s1429_s20 = sshll.u32 %s1979_s17, 6 }
  0x79   : > { %s2608_s0 = sld [smem:[#allocation25_spill]]  ;;  %s370_s29 = scalar_lea.vmem [#allocation4], %s1428_s21 }
  0x7a   : > { %s378_s24 = sshll.u32 %s370_s29, 4  ;;  %s2609_s22 = sshll.u32 %s1979_s17, 7  ;;  %s2278_s24 = int_to_ptr.vmem [resolvable:$true] %s378_s24 }
  0x7b   : > { %s2285_s8 = scalar_lea.hbm %s2545_s2, %s2609_s22  ;;  %s367_s10 = scalar_lea.sflag [#allocation5], %s2143_s11 }
  0x7c   : > { %p2610_p9 = scmp.ne.s32.totalorder %s2602_s28, 0 }
  0x7f   : > { %s2276_s27 = scalar_lea.hbm %s2608_s0, %s1429_s20  ;;  %s1806_s13 = scalar_lea.hbm %s2608_s0, 128 }
  0x80   : > { %s1801_s9 = scalar_lea.hbm %s2276_s27, 64  ;;  %p1807_p13 = scmp.lt.u32.totalorder %s2276_s27, %s2608_s0 }
  0x81   : > { %p1802_p7 = scmp.ne.s32.totalorder %s2276_s27, %s1801_s9  ;;  %p1808_p6 = scmp.lt.u32.totalorder %s1806_s13, %s1801_s9 }
  0x82   : > { %p1810_p3 = scmp.lt.u32.totalorder %s1801_s9, %s2276_s27 }
  0x83   : > { %p1804_p2 = pnand %p1802_p7, %p2610_p9  ;;  %p1809_p11 = por %p1808_p6, %p1807_p13 }
  0x85   : > { %p1805_p10 = pneg %p1804_p2  ;;  %p1811_p8 = por %p1810_p3, %p1809_p11 }
  0x87   : > { %p1812_p5 = pnand %p1811_p8, %p1805_p10 }
  0x89   : > { %1815 = shalt.err (!%p1812_p5)
}
  0x8a   : > { %s1816_s22 = scalar_lea.vmem %s2278_s24, 64  ;;  %s1990_s1 = smov [#allocation4]  }
  0x8b   : > { %p1817_p12 = scmp.ne.s32.totalorder %s2278_s24, %s1816_s22  ;;  %s1821_s3 = sshll.u32 %s1990_s1, 4  ;;  %s1822_s3 = int_to_ptr.vmem [resolvable:$false] %s1821_s3 }
  0x8c   : > { %s1823_s20 = scalar_lea.vmem %s1822_s3, 128  ;;  %p1824_p0 = scmp.lt.s32.totalorder %s2278_s24, %s1822_s3 }
  0x8d   : > { %p1819_p1 = pnand %p1817_p12, %p2610_p9  ;;  %p1825_p7 = scmp.lt.s32.totalorder %s1823_s20, %s1816_s22 }
  0x8f   : > { %p1820_p4 = pneg %p1819_p1  ;;  %p1826_p2 = por %p1825_p7, %p1824_p0 }
  0x91   : > { %p1827_p13 = pnand %p1826_p2, %p1820_p4 }
  0x93   : > { %1830 = shalt.err (!%p1827_p13)
}
  0x94   : > { %p2611_p10 = scmp.ne.s32.totalorder %s2599_s25, 0  ;;  %s2612_s9 = sshll.u32 %s2143_s11, 3 }
  0x95   : > { %s410_s12 = scalar_lea.vmem [#allocation9], %s2612_s9  ;;  %s1831_s21 = scalar_lea.hbm %s2285_s8, 128 }
  0x96   : > { %1605 = dma.hbm_to_vmem [thread:$0]  (!%p2611_p10), %s2276_s27, 64, %s2278_s24, %s367_s10  }
  0x97   : > { %s418_s13 = sshll.u32 %s410_s12, 4  ;;  %p1832_p6 = scmp.ne.s32.totalorder %s2285_s8, %s1831_s21  ;;  %s419_s13 = int_to_ptr.vmem [resolvable:$true] %s418_s13 }
  0x98   : > { %s1836_s1 = scalar_lea.hbm %s2545_s2, 256  ;;  %p1837_p8 = scmp.lt.u32.totalorder %s2285_s8, %s2545_s2 }
  0x99   : > { %p1834_p11 = pnand %p1832_p6, %p2610_p9  ;;  %p1838_p5 = scmp.lt.u32.totalorder %s1836_s1, %s1831_s21 }
  0x9a   : > { %p1840_p1 = scmp.lt.u32.totalorder %s1831_s21, %s2285_s8 }
  0x9b   : > { %p1835_p3 = pneg %p1834_p11  ;;  %p1839_p12 = por %p1838_p5, %p1837_p8 }
  0x9d   : > { %p1841_p4 = por %p1840_p1, %p1839_p12 }
  0x9f   : > { %p1842_p0 = pnand %p1841_p4, %p1835_p3 }
  0xa1   : > { %1845 = shalt.err (!%p1842_p0)
}
  0xa2   : > { %s1846_s11 = scalar_lea.vmem %s419_s13, 128  ;;  %s1991_s27 = smov [#allocation9]  }
  0xa3   : > { %p1847_p7 = scmp.ne.s32.totalorder %s419_s13, %s1846_s11  ;;  %s1851_s24 = sshll.u32 %s1991_s27, 4  ;;  %s1852_s24 = int_to_ptr.vmem [resolvable:$false] %s1851_s24 }
  0xa4   : > { %s1853_s10 = scalar_lea.vmem %s1852_s24, 256  ;;  %p1854_p6 = scmp.lt.s32.totalorder %s419_s13, %s1852_s24 }
  0xa5   : > { %p1849_p2 = pnand %p1847_p7, %p2610_p9  ;;  %p1855_p11 = scmp.lt.s32.totalorder %s1853_s10, %s1846_s11 }
  0xa7   : > { %p1850_p13 = pneg %p1849_p2  ;;  %p1856_p10 = por %p1855_p11, %p1854_p6 }
  0xa9   : > { %p1857_p5 = pnand %p1856_p10, %p1850_p13 }
  0xab   : > { %1860 = shalt.err (!%p1857_p5)
}
  0xac   : > { %p2613_p8 = scmp.ne.s32.totalorder %s2599_s25, 0  ;;  %p2614_p3 = scmp.ne.s32.totalorder %s2594_s26, 0 }
  0xad   : > { %s2332_s28 = sand.u32 (!%p2614_p3), 1, %s1967_s14   ;;  %p2615_p9 = scmp.ne.s32.totalorder (!%p2614_p3), %s2589_s23, 0 }
  0xae   : > { %1611 = dma.hbm_to_vmem [thread:$0]  (!%p2613_p8), %s2285_s8, 128, %s419_s13, %s2214_s16  }
  0xaf   : > { %427 = sbr.rel (%p2614_p3) target bundleno = 1671 (0x687), region = 56  ;;  %s1436_s9 = sshll.u32 (!%p2614_p3), %s2332_s28, 2 }
  0xb0   : > { %s430_s12 = scalar_lea.sflag (!%p2614_p3), [#allocation5], %s2332_s28  ;;  %s2336_s21 = scalar_lea.vmem (!%p2614_p3), [#allocation4], %s1436_s9 }
  0xb6   : > { %1942 = dma.done.wait (%p2615_p9), %s430_s12, 64  }
  0xb7   : > { %1944 = vsyncadd (%p2615_p9), %s430_s12, 4294967232  ;;  %s438_s26 = sand.u32 1, %s2094_s19   ;;  %s2344_s25 = sshll.u32 %s2332_s28, 3 }
  0xb8   : > { %s439_s16 = scalar_lea.sflag [#allocation8], %s438_s26  ;;  %s442_s8 = scalar_lea.vmem [#allocation7], %s2344_s25 }
  0xb9   : > { %1946 = dma.done.wait (%p2615_p9), %s439_s16, 256  }
  0xba   : > { %1948 = vsyncadd (%p2615_p9), %s439_s16, 4294967040  ;;  %s451_s13 = scalar_lea.vmem [#allocation9], %s2344_s25  ;;  %p2616_p10 = scmp.eq.s32.totalorder %s2094_s19, 0 }
  0xbc   : > { %1950 = dma.done.wait (%p2616_p10), [#allocation11], 640   ;;  %p2617_p12 = pmov %p2616_p10 }
  0xbd   : > { %v1992_v0 = vmov 0.0   ;;  %vm1993_vm0 = vmmov 0   ;;  %v1691_v1 = vld [vmem:[#allocation12] sm:$0xff]   ;;  %v1692_v2 = vld [vmem:[#allocation12 + $0x8] sm:$0xff]   ;;  %v1695_v3 = vld [vmem:[#allocation10] sm:$0xff]   ;;  %vm554_vm1 = vcmask 392192  }
  0xbe   : > { %1952 = vsyncadd (%p2617_p12), [#allocation11], 4294966656  ;;  %1503 = vmatprep.subr.bf16.mxu0 %v1992_v0  ;;  %1509 = vmatprep.mubr.msk.bf16.mxu0 %vm1993_vm0, %v1992_v0  ;;  %v1693_v4 = vld [vmem:[#allocation12 + $0x10] sm:$0xff]   ;;  %v1696_v5 = vld [vmem:[#allocation10 + $0x8] sm:$0xff]   ;;  %vm626_vm2 = vcmask 261120   ;;  %vm600_vm3 = vcmask 523264  }
  0xbf   : > { %1513 = vmatprep.subr.bf16.mxu1 %v1992_v0  ;;  %1517 = vmatprep.mubr.msk.bf16.mxu1 %vm1993_vm0, %v1992_v0  ;;  %v1694_v6 = vld [vmem:[%s442_s8] sm:$0xff]   ;;  %v602_v7 = vld [vmem:[%s2336_s21] sm:$0xf]  ;;  %vm674_vm4 = vcmask 64512   ;;  %s1994_s1 = smov 112   ;;  %s1995_s3 = smov 120  }
  0xc0   : > { %1504 = vmatpush3.bf16.msra.mxu0 %v1691_v1  ;;  %1514 = vmatpush3.bf16.msra.mxu1 %v1695_v3  ;;  %v1443_v8 = vld [vmem:[%s2549_s6] ss:$0 sm:$0xff]  ;;  %s1996_s20 = smov 104   ;;  %vm721_vm5 = vcmask 130048   ;;  %s1997_s11 = smov 96   ;;  %vm734_vm6 = vcmask 125952  }
  0xc1   : > { %1505 = vmatprep.subr.bf16.mxu0 %v1992_v0  ;;  %1515 = vmatprep.subr.bf16.mxu1 %v1992_v0  ;;  %v1449_v19 = vld [vmem:[%s2547_s4] ss:$0 sm:$0xff]  ;;  %s1998_s27 = smov 80   ;;  %s1999_s24 = smov 72   ;;  %vm901_vm7 = vcmask 130112   ;;  %vm1019_vm8 = vcmask 195712  }
  0xc2   : > { %v672_v35 = vld [vmem:[%s451_s13] sm:$0xff]  ;;  %s1442_s10 = sshll.u32 %s2332_s28, 4  ;;  %s2000_s9 = smov 88   ;;  %vm1137_vm9 = vcmask 261312  }
  0xc3   : > { %s2421_s12 = scalar_lea.vmem [#allocation14], %s1442_s10  ;;  %s2001_s21 = smov 8  }
  0xc4   : > { %1506 = vmatpush3.bf16.msra.mxu0 %v1692_v2  ;;  %1516 = vmatpush3.bf16.msra.mxu1 %v1696_v5  ;;  %s2618_s8 = sld [smem:[#allocation28_spill]]  ;;  %s2002_s23 = smov 16  }
  0xc5   : > { %1507 = vmatprep.subr.bf16.mxu0 %v1992_v0  ;;  %1521 = vmatprep.subr.bf16.mxu1 %v1992_v0  ;;  %s2003_s29 = smov 24   ;;  %s2619_s22 = sld [smem:[#allocation22_spill]] }
  0xc6   : > { %s2004_s26 = smov [#allocation14]  }
  0xc7   : > { %1518 = vmatmul.mubr.msk.bf16.vlgmr.msra.gmra.mrb[0].mxu1 %vm626_vm2, %v602_v7  ;;  %s1865_s16 = sshll.u32 %s2004_s26, 4  ;;  %s1866_s16 = int_to_ptr.vmem [resolvable:$false] %s1865_s16 }
  0xc8   : > { %1508 = vmatpush3.bf16.msra.mxu0 %v1693_v4  ;;  %1523 = vmatprep.mubr.msk.bf16.mxu1 %vm1993_vm0, %v1992_v0 }
  0xc9   : > { %1527 = vmatprep.subr.bf16.mxu0 %v1992_v0 }
  0xcb   : > { %1510 = vmatmul.mubr.msk.bf16.vlgmr.msra.gmra.mrb[0].mxu0 %vm554_vm1, %v1694_v6 }
  0xcc   : > { %1529 = vmatprep.mubr.msk.bf16.mxu0 %vm1993_vm0, %v1992_v0 }
 0x19a   : > { %v664_v10 = vpop.f32.mrb[0].mxu1 }
 0x19b   : > { %v1519_v12 = vpop.f32.mrb[1].mxu1  ;;  %v665_v21 = vadd.f32 %v1449_v19, %v664_v10 }
 0x19c   : > { %v667_v14 = vpop.f32.mrb[2].mxu1 }
 0x19d   : > { %v1520_v18 = vpop.f32.mrb[3].mxu1  ;;  %v670_v22 = vmul.f32 0.35355338, %v665_v21 }
 0x19e   : > { %v592_v9 = vpop.f32.mrb[0].mxu0 }
 0x19f   : > { %v1511_v11 = vpop.f32.mrb[1].mxu0  ;;  %v593_v15 = vadd.f32 %v1443_v8, %v592_v9  ;;  %v671_v24 = vpack.c.bf16 %v670_v22, %v670_v22 }
 0x1a0   : > { %v595_v13 = vpop.f32.mrb[2].mxu0 }
 0x1a1   : > { %v596_v16 = vadd.f32 %v1443_v8, %v595_v13  ;;  %v1512_v17 = vpop.f32.mrb[3].mxu0 }
 0x1a3   : > { %v599_v20 = vpack.c.bf16 %v596_v16, %v593_v15 }
 0x1a5   : > { %601 = vst.msk [vmem:[#allocation2] sm:$0xff] %vm600_vm3, %v599_v20 }
 0x1ac   : > { %v2379_v23 = vld [vmem:[#allocation2] sm:$0xff] }
 0x1ad   : > { %907 = vrot.lane.b32.xlu1 %v2379_v23, %s1994_s1  ;;  %789 = vrot.lane.b32.xlu0 %v2379_v23, %s1995_s3  ;;  %v679_v25 = vsel %vm674_vm4, %v2379_v23, 0 }
 0x1ae   : > { %1522 = vmatpush3.bf16.xpose.msra.mxu1 %v679_v25 }
 0x1af   : > { %1533 = vmatprep.subr.bf16.mxu1 %v1992_v0 }
 0x1b1   : > { %904 = vrot.lane.b32.xlu1 %v671_v24, %s1994_s1  ;;  %786 = vrot.lane.b32.xlu0 %v671_v24, %s1995_s3  ;;  %s2620_s1 = sld [smem:[#allocation23_spill]]  ;;  %s1476_s3 = sshll.u32 %s2619_s22, 8 }
 0x1b5   : > { %1022 = vrot.lane.b32.xlu1 %v671_v24, %s1996_s20  ;;  %1025 = vrot.lane.b32.xlu0 %v2379_v23, %s1996_s20  ;;  %s1242_s20 = sshll.u32 %s2421_s12, 4  ;;  %s2459_s20 = int_to_ptr.vmem [resolvable:$true] %s1242_s20 }
 0x1b6   : > { %1524 = vmatmul.mubr.msk.bf16.vlgmr.msra.gmra.mrb[4].mxu1 %vm674_vm4, %v671_v24  ;;  %p1868_p2 = scmp.lt.s32.totalorder %s2459_s20, %s1866_s16 }
 0x1b7   : > { %1535 = vmatprep.mubr.msk.bf16.mxu1 %vm1993_vm0, %v1992_v0  ;;  %p2622_p4 = scmp.ne.s32.totalorder %s2620_s1, 0 }
 0x21f   : > { %v790_v26 = vpop.permute.xlu0 %789  ;;  %v908_v28 = vpop.permute.xlu1 %907 }
 0x220   : > { %v795_v27 = vsel %vm674_vm4, %v790_v26, 0  ;;  %v913_v30 = vsel %vm674_vm4, %v908_v28, 0 }
 0x221   : > { %1534 = vmatpush3.bf16.xpose.msra.mxu1 %v795_v27 }
 0x222   : > { %1545 = vmatprep.subr.bf16.mxu1 %v1992_v0 }
 0x223   : > { %v787_v29 = vpop.permute.xlu0 %786  ;;  %v905_v32 = vpop.permute.xlu1 %904 }
 0x227   : > { %v1026_v31 = vpop.permute.xlu0 %1025  ;;  %v1023_v34 = vpop.permute.xlu1 %1022 }
 0x228   : > { %1536 = vmatmul.mubr.msk.bf16.vlgmr.msra.gmra.mrb[8].mxu1 %vm674_vm4, %v787_v29  ;;  %v1031_v33 = vsel %vm674_vm4, %v1026_v31, 0 }
 0x229   : > { %1546 = vmatpush3.bf16.xpose.msra.mxu1 %v913_v30  ;;  %1547 = vmatprep.mubr.msk.bf16.mxu1 %vm1993_vm0, %v1992_v0 }
 0x22a   : > { %1557 = vmatprep.subr.bf16.mxu1 %v1992_v0 }
 0x230   : > { %1548 = vmatmul.mubr.msk.bf16.vlgmr.msra.gmra.mrb[12].mxu1 %vm674_vm4, %v905_v32 }
 0x231   : > { %1558 = vmatpush3.bf16.xpose.msra.mxu1 %v1031_v33  ;;  %1559 = vmatprep.mubr.msk.bf16.mxu1 %vm1993_vm0, %v1992_v0 }
 0x232   : > { %1569 = vmatprep.subr.bf16.mxu1 %v1992_v0 }
 0x238   : > { %1560 = vmatmul.mubr.msk.bf16.vlgmr.msra.gmra.mrb[16].mxu1 %vm674_vm4, %v1023_v34 }
 0x239   : > { %1573 = vmatprep.mubr.msk.bf16.mxu1 %vm1993_vm0, %v1992_v0 }
 0x289   : > { %v715_v36 = vpop.f32.mrb[4].mxu1 }
 0x28a   : > { %v716_v37 = vadd.f32 %v715_v36, %v672_v35  ;;  %v1525_v38 = vpop.f32.mrb[5].mxu1 }
 0x28b   : > { %v718_v39 = vpop.f32.mrb[6].mxu1 }
 0x28c   : > { %v1526_v40 = vpop.f32.mrb[7].mxu1  ;;  %v722_v41 = vsel %vm721_vm5, %v716_v37, -inf }
 0x28d   : > { %723 = vmax.xlane.f32.xlu0 %v722_v41 }
 0x2fb   : > { %v831_v42 = vpop.f32.mrb[8].mxu1 }
 0x2fc   : > { %v832_v43 = vadd.f32 %v831_v42, %v672_v35  ;;  %v1537_v44 = vpop.f32.mrb[9].mxu1 }
 0x2fd   : > { %v834_v45 = vpop.f32.mrb[10].mxu1 }
 0x2fe   : > { %v1538_v46 = vpop.f32.mrb[11].mxu1  ;;  %v837_v47 = vsel %vm721_vm5, %v832_v43, -inf  ;;  %v1697_v45 = vld [vmem:[%s2618_s8] sm:$0xff]  }
 0x2ff   : > { %838 = vmax.xlane.f32.xlu1 %v837_v47  ;;  %1570 = vmatpush3.bf16.msra.mxu1 %v1697_v45  ;;  %v1698_v46 = vld [vmem:[%s2618_s8 + $0x8] sm:$0xff]  }
 0x300   : > { %1571 = vmatprep.subr.bf16.mxu1 %v1992_v0 }
 0x303   : > { %v949_v48 = vpop.f32.mrb[12].mxu1  ;;  %1572 = vmatpush3.bf16.msra.mxu1 %v1698_v46 }
 0x304   : > { %v950_v49 = vadd.f32 %v949_v48, %v672_v35  ;;  %v1549_v50 = vpop.f32.mrb[13].mxu1 }
 0x305   : > { %v952_v51 = vpop.f32.mrb[14].mxu1 }
 0x306   : > { %v1550_v52 = vpop.f32.mrb[15].mxu1  ;;  %v955_v53 = vsel %vm721_vm5, %v950_v49, -inf }
 0x307   : > { %956 = vmax.xlane.f32.xlu0 %v955_v53 }
 0x30b   : > { %v1067_v54 = vpop.f32.mrb[16].mxu1 }
 0x30c   : > { %v1068_v55 = vadd.f32 %v1067_v54, %v672_v35  ;;  %v1561_v56 = vpop.f32.mrb[17].mxu1 }
 0x30d   : > { %v1070_v57 = vpop.f32.mrb[18].mxu1 }
 0x30e   : > { %v1562_v58 = vpop.f32.mrb[19].mxu1  ;;  %v1073_v59 = vsel %vm721_vm5, %v1068_v55, -inf }
 0x30f   : > { %1074 = vmax.xlane.f32.xlu0 %v1073_v59 }
 0x31a   : > { %v724_v60 = vpop.xlane.xlu0 %723 }
 0x31b   : > { %v725_v61 = vsub.f32 %v716_v37, %v724_v60 }
 0x31d   : > { %v726_v62 = vmul.f32 1.442695, %v725_v61 }
 0x31f   : > { %1699 = vpow2.f32 %v726_v62 }
 0x329   : > { %v1700_v63 = vpop.eup %1699 }
 0x32a   : > { %v728_v1 = vsel %vm721_vm5, %v1700_v63, 0.0 }
 0x32b   : > { %729 = vadd.xlane.f32.xlu1 %v728_v1 }
 0x33c   : > { %737 = vrot.lane.b32.xlu1 %v2379_v23, %s1997_s11 }
 0x38c   : > { %v839_v2 = vpop.xlane.xlu1 %838 }
 0x38d   : > { %v840_v3 = vsub.f32 %v832_v43, %v839_v2 }
 0x38f   : > { %v841_v4 = vmul.f32 1.442695, %v840_v3 }
 0x391   : > { %1701 = vpow2.f32 %v841_v4 }
 0x394   : > { %v957_v5 = vpop.xlane.xlu0 %956 }
 0x395   : > { %v958_v6 = vsub.f32 %v950_v49, %v957_v5 }
 0x397   : > { %v959_v7 = vmul.f32 1.442695, %v958_v6 }
 0x399   : > { %1703 = vpow2.f32 %v959_v7 }
 0x39b   : > { %v1702_v8 = vpop.eup %1701 }
 0x39c   : > { %v1075_v9 = vpop.xlane.xlu0 %1074  ;;  %v843_v10 = vsel %vm721_vm5, %v1702_v8, 0.0 }
 0x39d   : > { %v1076_v11 = vsub.f32 %v1068_v55, %v1075_v9  ;;  %844 = vadd.xlane.f32.xlu0 %v843_v10 }
 0x39f   : > { %v1077_v12 = vmul.f32 1.442695, %v1076_v11 }
 0x3a1   : > { %1705 = vpow2.f32 %v1077_v12 }
 0x3a3   : > { %v1704_v13 = vpop.eup %1703 }
 0x3a4   : > { %v961_v14 = vsel %vm721_vm5, %v1704_v13, 0.0 }
 0x3a5   : > { %962 = vadd.xlane.f32.xlu1 %v961_v14 }
 0x3ab   : > { %v1706_v15 = vpop.eup %1705 }
 0x3ac   : > { %v1079_v16 = vsel %vm721_vm5, %v1706_v15, 0.0 }
 0x3ad   : > { %1080 = vadd.xlane.f32.xlu0 %v1079_v16 }
 0x3b6   : > { %969 = vrot.lane.b32.xlu1 %v2379_v23, %s1998_s27 }
 0x3b8   : > { %v730_v17 = vpop.xlane.xlu1 %729 }
 0x3b9   : > { %1707 = vrcp.f32 %v730_v17 }
 0x3ba   : > { %1087 = vrot.lane.b32.xlu1 %v2379_v23, %s1999_s24  ;;  %s2621_s24 = sld [smem:[#allocation31_spill]] }
 0x3bc   : > { %v738_v18 = vpop.permute.xlu1 %737 }
 0x3bd   : > { %1528 = vmatpush3.bf16.msra.mxu0 %v738_v18 }
 0x3be   : > { %1539 = vmatprep.subr.bf16.mxu0 %v1992_v0 }
 0x3c0   : > { %s2457_s10 = scalar_lea.hbm %s2621_s24, %s1476_s3 }
 0x3c3   : > { %v1708_v19 = vpop.eup %1707  ;;  %851 = vrot.lane.b32.xlu0 %v2379_v23, %s2000_s9  ;;  %s1214_s9 = scalar_lea.sflag [#allocation15], %s2332_s28 }
 0x3c4   : > { %v732_v20 = vmul.f32 %v1708_v19, %v1700_v63 }
 0x3c6   : > { %v733_v21 = vpack.c.bf16 %v732_v20, %v732_v20 }
 0x3c8   : > { %735 = vst.msk [vmem:[%s2421_s12] sm:$0xf] %vm734_vm6, %v733_v21  ;;  %1530 = vmatmul.mubr.msk.bf16.vlgmr.msra.gmra.mrb[4].mxu0 %vm721_vm5, %v733_v21 }
 0x3c9   : > { %1541 = vmatprep.mubr.msk.bf16.mxu0 %vm1993_vm0, %v1992_v0 }
 0x42a   : > { %v845_v22 = vpop.xlane.xlu0 %844 }
 0x42b   : > { %1709 = vrcp.f32 %v845_v22 }
 0x432   : > { %v963_v24 = vpop.xlane.xlu1 %962 }
 0x433   : > { %1711 = vrcp.f32 %v963_v24 }
 0x435   : > { %v1710_v23 = vpop.eup %1709 }
 0x436   : > { %v847_v25 = vmul.f32 %v1710_v23, %v1702_v8  ;;  %v970_v32 = vpop.permute.xlu1 %969 }
 0x438   : > { %v848_v26 = vpack.c.bf16 %v847_v25, %v847_v25 }
 0x43a   : > { %v1081_v27 = vpop.xlane.xlu0 %1080  ;;  %1456 = vst.msk [vmem:[%s2421_s12 + $0x4] sm:$0xf] %vm734_vm6, %v848_v26  ;;  %v1088_v36 = vpop.permute.xlu1 %1087 }
 0x43b   : > { %1713 = vrcp.f32 %v1081_v27 }
 0x43d   : > { %v1712_v28 = vpop.eup %1711 }
 0x43e   : > { %v965_v29 = vmul.f32 %v1712_v28, %v1704_v13  ;;  %v852_v30 = vpop.permute.xlu0 %851 }
 0x43f   : > { %1540 = vmatpush3.bf16.msra.mxu0 %v852_v30 }
 0x440   : > { %1551 = vmatprep.subr.bf16.mxu0 %v1992_v0  ;;  %v966_v31 = vpack.c.bf16 %v965_v29, %v965_v29 }
 0x442   : > { %1542 = vmatmul.mubr.msk.bf16.vlgmr.msra.gmra.mrb[8].mxu0 %vm721_vm5, %v848_v26  ;;  %1459 = vst.msk [vmem:[%s2421_s12 + $0x8] sm:$0xf] %vm734_vm6, %v966_v31 }
 0x443   : > { %1552 = vmatpush3.bf16.msra.mxu0 %v970_v32  ;;  %1553 = vmatprep.mubr.msk.bf16.mxu0 %vm1993_vm0, %v1992_v0 }
 0x444   : > { %1563 = vmatprep.subr.bf16.mxu0 %v1992_v0 }
 0x445   : > { %v1714_v33 = vpop.eup %1713 }
 0x446   : > { %v1083_v34 = vmul.f32 %v1714_v33, %v1706_v15 }
 0x448   : > { %v1084_v35 = vpack.c.bf16 %v1083_v34, %v1083_v34 }
 0x44a   : > { %1554 = vmatmul.mubr.msk.bf16.vlgmr.msra.gmra.mrb[12].mxu0 %vm721_vm5, %v966_v31  ;;  %1462 = vst.msk [vmem:[%s2421_s12 + $0xc] sm:$0xf] %vm734_vm6, %v1084_v35  ;;  %s1867_s12 = scalar_lea.vmem %s1866_s16, 512 }
 0x44b   : > { %1564 = vmatpush3.bf16.msra.mxu0 %v1088_v36  ;;  %1565 = vmatprep.mubr.msk.bf16.mxu0 %vm1993_vm0, %v1992_v0 }
 0x452   : > { %1566 = vmatmul.mubr.msk.bf16.vlgmr.msra.gmra.mrb[16].mxu0 %vm721_vm5, %v1084_v35 }
 0x49b   : > { %v777_v37 = vpop.f32.mrb[4].mxu0 }
 0x49c   : > { %783 = vst.msk [vmem:[#allocation3] sm:$0xff] %vm674_vm4, %v777_v37  ;;  %v1531_v38 = vpop.f32.mrb[5].mxu0 }
 0x49d   : > { %v780_v39 = vpop.f32.mrb[6].mxu0 }
 0x49e   : > { %v1532_v40 = vpop.f32.mrb[7].mxu0 }
 0x515   : > { %v891_v41 = vpop.f32.mrb[8].mxu0 }
 0x516   : > { %898 = vrot.lane.b32.xlu0 %v891_v41, %s2001_s21  ;;  %v1543_v42 = vpop.f32.mrb[9].mxu0  ;;  %s1861_s21 = scalar_lea.vmem %s2459_s20, 256 }
 0x517   : > { %v894_v43 = vpop.f32.mrb[10].mxu0  ;;  %p1862_p1 = scmp.ne.s32.totalorder %s2459_s20, %s1861_s21  ;;  %p1869_p13 = scmp.lt.s32.totalorder %s1867_s12, %s1861_s21 }
 0x518   : > { %v1544_v44 = vpop.f32.mrb[11].mxu0 }
 0x519   : > { %p1863_p0 = pnand %p1862_p1, %p2622_p4  ;;  %p1870_p6 = por %p1869_p13, %p1868_p2 }
 0x51b   : > { %p1864_p7 = pneg %p1863_p0 }
 0x51d   : > { %v1009_v47 = vpop.f32.mrb[12].mxu0  ;;  %p1871_p11 = pnand %p1870_p6, %p1864_p7 }
 0x51e   : > { %1016 = vrot.lane.b32.xlu1 %v1009_v47, %s2002_s23  ;;  %v1555_v48 = vpop.f32.mrb[13].mxu0 }
 0x51f   : > { %v1012_v49 = vpop.f32.mrb[14].mxu0 }
 0x520   : > { %v1556_v50 = vpop.f32.mrb[15].mxu0 }
 0x525   : > { %v1127_v51 = vpop.f32.mrb[16].mxu0 }
 0x526   : > { %1134 = vrot.lane.b32.xlu0 %v1127_v51, %s2003_s29  ;;  %v1567_v52 = vpop.f32.mrb[17].mxu0 }
 0x527   : > { %v1130_v53 = vpop.f32.mrb[18].mxu0 }
 0x528   : > { %v1568_v54 = vpop.f32.mrb[19].mxu0 }
 0x588   : > { %v899_v55 = vpop.permute.xlu0 %898 }
 0x589   : > { %902 = vst.msk [vmem:[#allocation3] sm:$0xff] %vm901_vm7, %v899_v55 }
 0x590   : > { %v1017_v0 = vpop.permute.xlu1 %1016 }
 0x591   : > { %1020 = vst.msk [vmem:[#allocation3] sm:$0xff] %vm1019_vm8, %v1017_v0 }
 0x598   : > { %v1135_v56 = vpop.permute.xlu0 %1134 }
 0x599   : > { %1138 = vst.msk [vmem:[#allocation3] sm:$0xff] %vm1137_vm9, %v1135_v56 }
 0x5a0   : > { %v1139_v57 = vld [vmem:[#allocation3] sm:$0xff] }
 0x5a1   : > { %v1140_v58 = vpack.c.bf16 %v1139_v57, %v1139_v57 }
 0x5a3   : > { %1574 = vmatmul.mubr.msk.bf16.vlgmr.msra.gmra.mrb[20].mxu1 %vm626_vm2, %v1140_v58 }
 0x5a4   : > { %1874 = shalt.err (!%p1871_p11)
}
 0x5a5   : > { %s1875_s13 = scalar_lea.hbm %s2457_s10, 256  ;;  %s1879_s29 = scalar_lea.hbm %s2621_s24, 512 }
 0x5a6   : > { %p1876_p5 = scmp.ne.s32.totalorder %s2457_s10, %s1875_s13  ;;  %p1880_p9 = scmp.lt.u32.totalorder %s2457_s10, %s2621_s24 }
 0x5a7   : > { %p1881_p10 = scmp.lt.u32.totalorder %s1879_s29, %s1875_s13  ;;  %p1883_p1 = scmp.lt.u32.totalorder %s1875_s13, %s2457_s10 }
 0x5a8   : > { %p1877_p8 = pnand %p1876_p5, %p2622_p4 }
 0x5a9   : > { %p1882_p12 = por %p1881_p10, %p1880_p9 }
 0x5aa   : > { %p1878_p3 = pneg %p1877_p8 }
 0x5ab   : > { %p1884_p0 = por %p1883_p1, %p1882_p12 }
 0x5ad   : > { %p1885_p7 = pnand %p1884_p0, %p1878_p3 }
 0x5af   : > { %1888 = shalt.err (!%p1885_p7)
}
 0x5b0   : > { %s2005_s27 = smov 64   ;;  %s2006_s21 = smov 4  }
 0x5b1   : > { %1592 = dma.vmem_to_hbm [thread:$0]  (%p2622_p4), %s2459_s20, 256, %s2457_s10, %s1214_s9, %s2005_s27, %s2005_s27, %s2006_s21  }
 0x5b2   : > { %s2623_s12 = sld [smem:[#allocation29_spill]]  ;;  %s1470_s13 = sshll.u32 %s2619_s22, 7 }
 0x5b3   : > { %s503_s19 = scalar_lea.vmem [#allocation13], %s2344_s25  ;;  %s2624_s11 = sld [smem:[#allocation30_spill]] }
 0x5b4   : > { %s1228_s23 = sshll.u32 %s503_s19, 4  ;;  %s1209_s22 = scalar_lea.sflag [#allocation6], %s2332_s28  ;;  %s2495_s23 = int_to_ptr.vmem [resolvable:$true] %s1228_s23 }
 0x5b5   : > { %s1889_s25 = scalar_lea.vmem %s2495_s23, 128  ;;  %s2007_s20 = smov [#allocation13]  }
 0x5b6   : > { %p1890_p2 = scmp.ne.s32.totalorder %s2495_s23, %s1889_s25  ;;  %s1893_s10 = sshll.u32 %s2007_s20, 4  ;;  %s1894_s10 = int_to_ptr.vmem [resolvable:$false] %s1893_s10 }
 0x5b7   : > { %s1895_s9 = scalar_lea.vmem %s1894_s10, 256  ;;  %p1896_p11 = scmp.lt.s32.totalorder %s2495_s23, %s1894_s10 }
 0x5b8   : > { %v1464_v59 = vld [vmem:[%s2623_s12] ss:$0 sm:$0xff]  ;;  %p1891_p13 = pnand %p1890_p2, %p2622_p4  ;;  %p1897_p5 = scmp.lt.s32.totalorder %s1895_s9, %s1889_s25 }
 0x5b9   : > { %s2493_s0 = scalar_lea.hbm %s2624_s11, %s1470_s13 }
 0x5ba   : > { %p1892_p6 = pneg %p1891_p13  ;;  %p1898_p8 = por %p1897_p5, %p1896_p11 }
 0x5bc   : > { %p1899_p3 = pnand %p1898_p8, %p1892_p6 }
 0x676   : > { %v1201_v60 = vpop.f32.mrb[20].mxu1 }
 0x677   : > { %v1202_v61 = vadd.f32 %v1464_v59, %v1201_v60  ;;  %v1575_v62 = vpop.f32.mrb[21].mxu1 }
 0x678   : > { %v1204_v63 = vpop.f32.mrb[22].mxu1 }
 0x679   : > { %v1576_v1 = vpop.f32.mrb[23].mxu1  ;;  %1207 = vst.msk [vmem:[%s503_s19] sm:$0xff] %vm626_vm2, %v1202_v61 }
 0x67a   : > { %1902 = shalt.err (!%p1899_p3)
}
 0x67b   : > { %s1903_s28 = scalar_lea.hbm %s2493_s0, 128  ;;  %s1907_s26 = scalar_lea.hbm %s2624_s11, 256 }
 0x67c   : > { %p1904_p9 = scmp.ne.s32.totalorder %s2493_s0, %s1903_s28  ;;  %p1908_p1 = scmp.lt.u32.totalorder %s2493_s0, %s2624_s11 }
 0x67d   : > { %p1909_p0 = scmp.lt.u32.totalorder %s1907_s26, %s1903_s28  ;;  %p1911_p2 = scmp.lt.u32.totalorder %s1903_s28, %s2493_s0 }
 0x67e   : > { %p1905_p10 = pnand %p1904_p9, %p2622_p4 }
 0x67f   : > { %p1910_p7 = por %p1909_p0, %p1908_p1 }
 0x680   : > { %p1906_p12 = pneg %p1905_p10 }
 0x681   : > { %p1912_p13 = por %p1911_p2, %p1910_p7 }
 0x683   : > { %p1913_p6 = pnand %p1912_p13, %p1906_p12 }
 0x685   : > { %1916 = shalt.err (!%p1913_p6)
}
 0x686   : > { %1591 = dma.vmem_to_hbm [thread:$0]  (%p2622_p4), %s2495_s23, 128, %s2493_s0, %s1209_s22  }
 0x687 PF: > { %s2625_s13 = sld [smem:[#allocation21_spill]]  ;;  %s2626_s19 = sld [smem:[#allocation24_spill]] }
 0x688   : > { %p2628_p5 = scmp.ge.s32.totalorder %s1983_s18, 2 }
 0x68d   : > { %s1257_s29 = sand.u32 1, %s2625_s13   ;;  %p2627_p11 = scmp.ne.s32.totalorder %s2626_s19, 0 }
 0x68e   : > { %s1258_s3 = scalar_lea.sflag [#allocation6], %s1257_s29 }
 0x68f   : > { %p1613_p8 = pnand %p2628_p5, %p2627_p11 }
 0x691   : > { %1954 = dma.done.wait (!%p1613_p8), %s1258_s3, 128  }
 0x692   : > { %1956 = vsyncadd (!%p1613_p8), %s1258_s3, 4294967168  ;;  %s1267_s25 = scalar_lea.sflag [#allocation15], %s1257_s29 }
 0x693   : > { %1958 = dma.done.wait (!%p1613_p8), %s1267_s25, 256  }
 0x694   : > { %1960 = vsyncadd (!%p1613_p8), %s1267_s25, 4294967040  ;;  %s34_s18 = sadd.s32 1, %s1983_s18   ;;  %s2629_s13 = smov %s1967_s14 }
 0x695   : > { %p31_p3 = scmp.ge.s32.totalorder %s34_s18, 4   ;;  %s2630_s14 = smov %s1971_s15 }
 0x696   : > { %s2631_s15 = smov %s2199_s7  ;;  %s2632_s16 = smov %s1979_s17 }
 0x697   : > { %s2633_s17 = smov %s2635_s30  ;;  %33 = sbr.rel (!%p31_p3) target bundleno = 19 (0x13), region = 157 }
 0x69e   :  { %1272 = vsyncpa [#allocation5], 1 }
 0x69f   :  { %1274 = vsyncpa [#allocation5 + $0x1], 1 }
 0x6a0   :  { %1275 = vsyncpa [#allocation8], 1 }
 0x6a1   :  { %1277 = vsyncpa [#allocation8 + $0x1], 1 }
 0x6a2   :  { %1278 = vsyncpa [#allocation11], 1 }
 0x6a3   :  { %1279 = vsyncpa [#allocation6], 1 }
 0x6a4   :  { %1281 = vsyncpa [#allocation6 + $0x1], 1 }
 0x6a5   :  { %1282 = vsyncpa [#allocation15], 1 }
 0x6a6   :  { %1284 = vsyncpa [#allocation15 + $0x1], 1 }

</bundles_post_ra>
